<compile_context>
chip_gen: v7x
topology: tpu7x:2x2x1
jax: 0.10.0
libtpu: 0.0.40
codegen_flags: <defaults>
</compile_context>

<pallas_src>
import functools

import jax
import jax.numpy as jnp
from jax.experimental import pallas as pl
from jax.experimental.pallas import tpu as pltpu


def _value_pointer_kernel(src_ref, val_ref, w_ref, b_ref, truth_ref, out_ref):
    """One grid step == one batch tile of TB examples, both pointer heads fused.

    src_ref   : (TB, S, H)   f32  source-token embeddings (ori_src_embedding[bi, :src_len])
    val_ref   : (TB, V, H)   f32  value vectors (sketch_enc_outputs[bi, value_appear_id])
    w_ref     : (2H, 2)      f32  fused [start | end] Linear weights; rows 0:H act on the src
                                  half of the concat, rows H:2H on the value half
    b_ref     : (2,)         f32  SMEM  [start_bias, end_bias]
    truth_ref : (TB, 2V, 1)  i32  truth src index; rows 0:V = start head, V:2V = end head
    out_ref   : (1, 2, TB)   f32  out[0, k, b] = sum_v log softmax(score_k[b])[v, truth]
    """
    TB, S, H = src_ref.shape
    V = val_ref.shape[1]

    w_src = w_ref[0:H, :]          # (H, 2)  acts on the src half of the concat
    w_val = w_ref[H:2 * H, :]      # (H, 2)  acts on the value half of the concat

    # Batched value projection: one MXU call for the whole tile and both heads.
    #   val_proj[b*V + v, k] = <val[b, v], w_val[:, k]>
    val_flat = val_ref[...].reshape(TB * V, H)
    val_proj = jnp.dot(val_flat, w_val, preferred_element_type=jnp.float32)   # (TB*V, 2)

    # Hoisted loop invariants (no per-iteration iota / broadcast rebuilds).
    lane = jax.lax.broadcasted_iota(jnp.int32, (2 * V, S), 1)                 # (2V, S)
    bias_col = jnp.concatenate(
        [jnp.full((V, 1), b_ref[0], jnp.float32),
         jnp.full((V, 1), b_ref[1], jnp.float32)], axis=0)                    # (2V, 1)

    cols_s, cols_e = [], []        # per-example (1, 1) log-prob sums, per head
    for b in range(TB):            # statically unrolled over the batch tile
        src_b = src_ref[b]                                                    # (S, H)

        # Both heads' src projection in one MXU call, S kept lane-major:
        #   src_rows[k, s] = <src[s], w_src[:, k]>
        src_rows = jax.lax.dot_general(                                       # (2, S)
            w_src, src_b, (((0,), (1,)), ((), ())),
            preferred_element_type=jnp.float32)
        val_cols = val_proj[b * V:(b + 1) * V, :]                             # (V, 2)

        # Fused score slab for both heads (identical to cat((src, val), -1) @ W_k + b_k):
        #   rows 0:V  -> start head, rows V:2V -> end head
        score = jnp.concatenate(
            [val_cols[:, 0:1] + src_rows[0:1, :],
             val_cols[:, 1:2] + src_rows[1:2, :]], axis=0) + bias_col         # (2V, S)

        # log softmax(score)[row, truth[row]] via log-sum-exp.
        m = jnp.max(score, axis=-1, keepdims=True)                            # (2V, 1)
        denom = jnp.sum(jnp.exp(score - m), axis=-1, keepdims=True)           # (2V, 1)
        truth = truth_ref[b]                                                  # (2V, 1) i32
        picked = jnp.sum(jnp.where(lane == truth, score, 0.0),
                         axis=-1, keepdims=True)                              # (2V, 1)
        lp = picked - m - jnp.log(denom)                                      # (2V, 1)

        cols_s.append(jnp.sum(lp[0:V], keepdims=True))                        # (1, 1)
        cols_e.append(jnp.sum(lp[V:2 * V], keepdims=True))                    # (1, 1)

    # Single lane-dense store per grid step: (2, TB) slab.
    out_ref[0] = jnp.concatenate(
        [jnp.concatenate(cols_s, axis=1),
         jnp.concatenate(cols_e, axis=1)], axis=0)                            # (2, TB)


@functools.partial(jax.jit, static_argnames=("batch_tile",))
def value_pointer_loss(src_emb, val_emb, w_start, b_start, w_end, b_end,
                       truth_start_ids, truth_end_ids, *, batch_tile=8):
    """Returns (start_prob_var, end_prob_var), each of shape (B,)."""
    B, S, H = src_emb.shape
    V = val_emb.shape[1]

    # Batch tile: many batch elements per grid step.  TB is tunable; at production
    # shapes size it against scoped VMEM (double-buffered inputs: 2 x TB*(S+V)*H*4B).
    TB = min(batch_tile, B)
    nb = pl.cdiv(B, TB)
    B_pad = nb * TB

    src = src_emb.astype(jnp.float32)
    val = val_emb.astype(jnp.float32)

    # Fuse the start/end heads: (2H, 2) weight, (2,) bias, (B, 2V, 1) truth ids.
    w_both = jnp.concatenate(
        [w_start.reshape(2 * H, 1), w_end.reshape(2 * H, 1)], axis=1).astype(jnp.float32)
    b_both = jnp.stack([b_start.reshape(()), b_end.reshape(())]).astype(jnp.float32)
    truth = jnp.concatenate([truth_start_ids, truth_end_ids], axis=1)   # (B, 2V)
    truth = truth.reshape(B, 2 * V, 1).astype(jnp.int32)

    if B_pad != B:   # pad batch to a multiple of the batch tile (padded rows discarded)
        pad = B_pad - B
        src = jnp.pad(src, ((0, pad), (0, 0), (0, 0)))
        val = jnp.pad(val, ((0, pad), (0, 0), (0, 0)))
        truth = jnp.pad(truth, ((0, pad), (0, 0), (0, 0)))

    grid_spec = pltpu.PrefetchScalarGridSpec(
        num_scalar_prefetch=0,
        grid=(nb,),
        in_specs=[
            pl.BlockSpec((TB, S, H), lambda i: (i, 0, 0)),          # src embeddings
            pl.BlockSpec((TB, V, H), lambda i: (i, 0, 0)),          # value vectors
            pl.BlockSpec((2 * H, 2), lambda i: (0, 0)),             # fused start/end W
            pl.BlockSpec(memory_space=pltpu.MemorySpace.SMEM),      # fused biases (SMEM)
            pl.BlockSpec((TB, 2 * V, 1), lambda i: (i, 0, 0)),      # fused truth ids
        ],
        out_specs=pl.BlockSpec((1, 2, TB), lambda i: (i, 0, 0)),
    )

    out = pl.pallas_call(
        _value_pointer_kernel,
        out_shape=jax.ShapeDtypeStruct((nb, 2, TB), jnp.float32),
        grid_spec=grid_spec,
        compiler_params=pltpu.CompilerParams(
            dimension_semantics=("parallel",)),   # disjoint output blocks per step
    )(src, val, w_both, b_both, truth)

    out = jnp.transpose(out, (1, 0, 2)).reshape(2, B_pad)[:, :B]   # (2, B)
    return out[0], out[1]


def _reference(src_emb, val_emb, w_s, b_s, w_e, b_e, ts, te):
    """Pure-JAX mirror of the PyTorch per-batch loop (concat -> Linear -> softmax ->
    gather at truth id -> log -> sum over values)."""
    B, S, H = src_emb.shape
    V = val_emb.shape[1]
    src_rep = jnp.broadcast_to(src_emb[:, None, :, :], (B, V, S, H))
    val_rep = jnp.broadcast_to(val_emb[:, :, None, :], (B, V, S, H))
    cat = jnp.concatenate([src_rep, val_rep], axis=-1)            # (B, V, S, 2H)

    def one(w, b, truth):
        score = jnp.einsum('bvsh,ho->bvso', cat, w.reshape(2 * H, 1))[..., 0] + b.reshape(())
        prob = jax.nn.softmax(score, axis=-1)                     # (B, V, S)
        picked = jnp.take_along_axis(prob, truth[:, :, None].astype(jnp.int32),
                                     axis=-1)[..., 0]             # (B, V)
        return jnp.sum(jnp.log(picked), axis=-1)                  # (B,)

    return one(w_s, b_s, ts), one(w_e, b_e, te)


if __name__ == "__main__":
    # Small shapes implied by the forward pass:
    #   B = batch, S = src_len (question tokens), V = value_len (values to point from),
    #   H = hidden_size of the encoders.
    B, S, V, H = 2, 16, 8, 32

    key = jax.random.PRNGKey(0)
    k_src, k_val, k_ws, k_bs, k_we, k_be, k_ts, k_te = jax.random.split(key, 8)

    # Synthetic stand-ins for BERT-derived src embeddings and sketch-encoder value vectors.
    src_emb = jax.random.normal(k_src, (B, S, H), dtype=jnp.float32)
    val_emb = jax.random.normal(k_val, (B, V, H), dtype=jnp.float32)

    # Deterministic parameter init for start/end pointer Linear(2H, 1).
    w_start = jax.random.normal(k_ws, (2 * H, 1), dtype=jnp.float32) * 0.1
    b_start = jax.random.normal(k_bs, (1,), dtype=jnp.float32) * 0.1
    w_end = jax.random.normal(k_we, (2 * H, 1), dtype=jnp.float32) * 0.1
    b_end = jax.random.normal(k_be, (1,), dtype=jnp.float32) * 0.1

    # Truth start/end source indices per value (batch.truth_start_ids / truth_end_ids).
    truth_start_ids = jax.random.randint(k_ts, (B, V), 0, S, dtype=jnp.int32)
    truth_end_ids = jax.random.randint(k_te, (B, V), 0, S, dtype=jnp.int32)

    start_lp, end_lp = value_pointer_loss(
        src_emb, val_emb, w_start, b_start, w_end, b_end,
        truth_start_ids, truth_end_ids)
    jax.block_until_ready((start_lp, end_lp))

    ref_start, ref_end = _reference(
        src_emb, val_emb, w_start, b_start, w_end, b_end,
        truth_start_ids, truth_end_ids)

    assert start_lp.shape == (B,) and end_lp.shape == (B,)
    assert jnp.allclose(start_lp, ref_start, rtol=1e-4, atol=1e-4), (start_lp, ref_start)
    assert jnp.allclose(end_lp, ref_end, rtol=1e-4, atol=1e-4), (end_lp, ref_end)

    print("KERNEL_OK")
</pallas_src>

<mosaic_0001>
module attributes {stable_mosaic.version = 11 : i64} {
  func.func @_value_pointer_kernel(%arg0: i32, %arg1: memref<2x16x32xf32, #tpu.memory_space<vmem>>, %arg2: memref<2x8x32xf32, #tpu.memory_space<vmem>>, %arg3: memref<64x2xf32, #tpu.memory_space<vmem>>, %arg4: memref<2xf32, #tpu.memory_space<smem>>, %arg5: memref<2x16x1xi32, #tpu.memory_space<vmem>>, %arg6: memref<1x2x2xf32, #tpu.memory_space<vmem>>) attributes {dimension_semantics = [#tpu.dimension_semantics<parallel>], iteration_bounds = array<i64: 1>, scalar_prefetch = 0 : i64, scratch_operands = 0 : i64, tpu.core_type = #tpu.core_type<tc>, window_params = [{transform_indices = @transform_0, window_bounds = array<i64: 2, 16, 32>}, {transform_indices = @transform_1, window_bounds = array<i64: 2, 8, 32>}, {pipeline_mode = #tpu.pipeline_mode<synchronous>, transform_indices = @transform_2, window_bounds = array<i64: 64, 2>}, {transform_indices = @transform_3, window_bounds = array<i64: 2>}, {transform_indices = @transform_4, window_bounds = array<i64: 2, 16, 1>}, {transform_indices = @transform_5, window_bounds = array<i64: 1, 2, 2>}]} {
    %c0 = arith.constant 0 : index
    %c0_0 = arith.constant 0 : index
    %0 = vector.load %arg3[%c0, %c0_0] : memref<64x2xf32, #tpu.memory_space<vmem>>, vector<32x2xf32>
    %c32 = arith.constant 32 : index
    %c0_1 = arith.constant 0 : index
    %1 = vector.load %arg3[%c32, %c0_1] : memref<64x2xf32, #tpu.memory_space<vmem>>, vector<32x2xf32>
    %c0_2 = arith.constant 0 : index
    %c0_3 = arith.constant 0 : index
    %c0_4 = arith.constant 0 : index
    %2 = vector.load %arg2[%c0_2, %c0_3, %c0_4] : memref<2x8x32xf32, #tpu.memory_space<vmem>>, vector<2x8x32xf32>
    %3 = vector.shape_cast %2 : vector<2x8x32xf32> to vector<16x32xf32>
    %cst = arith.constant dense<0.000000e+00> : vector<16x2xf32>
    %4 = tpu.matmul %3, %1, %cst {dimension_numbers = #tpu.dot_dimension_numbers<[1], [0], [0], [1], [0, 0, 1, 1], [], []>} : vector<16x32xf32>, vector<32x2xf32>, vector<16x2xf32> -> vector<16x2xf32>
    %5 = tpu.iota {dimensions = array<i32: 1>} : vector<16x16xi32>
    %c0_5 = arith.constant 0 : index
    %6 = memref.load %arg4[%c0_5] : memref<2xf32, #tpu.memory_space<smem>>
    %7 = vector.broadcast %6 : f32 to vector<8x1xf32>
    %c1 = arith.constant 1 : index
    %8 = memref.load %arg4[%c1] : memref<2xf32, #tpu.memory_space<smem>>
    %9 = vector.broadcast %8 : f32 to vector<8x1xf32>
    %10 = tpu.concatenate %7, %9 in 0 : vector<8x1xf32>, vector<8x1xf32> -> vector<16x1xf32>
    %c0_6 = arith.constant 0 : index
    %c0_7 = arith.constant 0 : index
    %c0_8 = arith.constant 0 : index
    %11 = vector.load %arg1[%c0_6, %c0_7, %c0_8] : memref<2x16x32xf32, #tpu.memory_space<vmem>>, vector<1x16x32xf32>
    %12 = vector.shape_cast %11 : vector<1x16x32xf32> to vector<16x32xf32>
    %cst_9 = arith.constant dense<0.000000e+00> : vector<2x16xf32>
    %13 = tpu.matmul %0, %12, %cst_9 {dimension_numbers = #tpu.dot_dimension_numbers<[0], [1], [1], [0], [0, 1, 1, 0], [], []>} : vector<32x2xf32>, vector<16x32xf32>, vector<2x16xf32> -> vector<2x16xf32>
    %14 = vector.extract_strided_slice %4 {offsets = [0, 0], sizes = [8, 2], strides = [1, 1]} : vector<16x2xf32> to vector<8x2xf32>
    %15 = vector.extract_strided_slice %14 {offsets = [0, 0], sizes = [8, 1], strides = [1, 1]} : vector<8x2xf32> to vector<8x1xf32>
    %16 = vector.extract_strided_slice %13 {offsets = [0, 0], sizes = [1, 16], strides = [1, 1]} : vector<2x16xf32> to vector<1x16xf32>
    %17 = vector.broadcast %15 : vector<8x1xf32> to vector<8x16xf32>
    %18 = vector.broadcast %16 : vector<1x16xf32> to vector<8x16xf32>
    %19 = arith.addf %17, %18 : vector<8x16xf32>
    %20 = vector.extract_strided_slice %14 {offsets = [0, 1], sizes = [8, 1], strides = [1, 1]} : vector<8x2xf32> to vector<8x1xf32>
    %21 = vector.extract_strided_slice %13 {offsets = [1, 0], sizes = [1, 16], strides = [1, 1]} : vector<2x16xf32> to vector<1x16xf32>
    %22 = vector.broadcast %20 : vector<8x1xf32> to vector<8x16xf32>
    %23 = vector.broadcast %21 : vector<1x16xf32> to vector<8x16xf32>
    %24 = arith.addf %22, %23 : vector<8x16xf32>
    %25 = tpu.concatenate %19, %24 in 0 : vector<8x16xf32>, vector<8x16xf32> -> vector<16x16xf32>
    %26 = vector.broadcast %10 : vector<16x1xf32> to vector<16x16xf32>
    %27 = arith.addf %25, %26 : vector<16x16xf32>
    %cst_10 = arith.constant dense<0xFF800000> : vector<16xf32>
    %28 = vector.multi_reduction <maximumf>, %27, %cst_10 [1] : vector<16x16xf32> to vector<16xf32>
    %29 = vector.shape_cast %28 : vector<16xf32> to vector<16x1xf32>
    %30 = vector.broadcast %29 : vector<16x1xf32> to vector<16x16xf32>
    %31 = arith.subf %27, %30 : vector<16x16xf32>
    %32 = math.exp %31 : vector<16x16xf32>
    %cst_11 = arith.constant dense<0.000000e+00> : vector<16xf32>
    %33 = vector.multi_reduction <add>, %32, %cst_11 [1] : vector<16x16xf32> to vector<16xf32>
    %34 = vector.shape_cast %33 : vector<16xf32> to vector<16x1xf32>
    %c0_12 = arith.constant 0 : index
    %c0_13 = arith.constant 0 : index
    %c0_14 = arith.constant 0 : index
    %35 = vector.load %arg5[%c0_12, %c0_13, %c0_14] : memref<2x16x1xi32, #tpu.memory_space<vmem>>, vector<1x16x1xi32>
    %36 = vector.shape_cast %35 : vector<1x16x1xi32> to vector<16x1xi32>
    %37 = vector.broadcast %36 : vector<16x1xi32> to vector<16x16xi32>
    %38 = arith.cmpi eq, %5, %37 : vector<16x16xi32>
    %cst_15 = arith.constant 0.000000e+00 : f32
    %39 = vector.broadcast %cst_15 : f32 to vector<16x16xf32>
    %40 = arith.select %38, %27, %39 : vector<16x16xi1>, vector<16x16xf32>
    %cst_16 = arith.constant dense<0.000000e+00> : vector<16xf32>
    %41 = vector.multi_reduction <add>, %40, %cst_16 [1] : vector<16x16xf32> to vector<16xf32>
    %42 = vector.shape_cast %41 : vector<16xf32> to vector<16x1xf32>
    %43 = arith.subf %42, %29 : vector<16x1xf32>
    %44 = math.log %34 : vector<16x1xf32>
    %45 = arith.subf %43, %44 : vector<16x1xf32>
    %46 = vector.extract_strided_slice %45 {offsets = [0, 0], sizes = [8, 1], strides = [1, 1]} : vector<16x1xf32> to vector<8x1xf32>
    %47 = vector.shape_cast %46 : vector<8x1xf32> to vector<1x8x1xf32>
    %cst_17 = arith.constant dense<0.000000e+00> : vector<1xf32>
    %48 = vector.multi_reduction <add>, %47, %cst_17 [1, 2] : vector<1x8x1xf32> to vector<1xf32>
    %49 = vector.shape_cast %48 : vector<1xf32> to vector<1x1x1xf32>
    %50 = vector.extract %49[0, 0, 0] : f32 from vector<1x1x1xf32>
    %51 = vector.broadcast %50 : f32 to vector<1x1xf32>
    %52 = vector.extract_strided_slice %45 {offsets = [8, 0], sizes = [8, 1], strides = [1, 1]} : vector<16x1xf32> to vector<8x1xf32>
    %53 = vector.shape_cast %52 : vector<8x1xf32> to vector<1x8x1xf32>
    %cst_18 = arith.constant dense<0.000000e+00> : vector<1xf32>
    %54 = vector.multi_reduction <add>, %53, %cst_18 [1, 2] : vector<1x8x1xf32> to vector<1xf32>
    %55 = vector.shape_cast %54 : vector<1xf32> to vector<1x1x1xf32>
    %56 = vector.extract %55[0, 0, 0] : f32 from vector<1x1x1xf32>
    %57 = vector.broadcast %56 : f32 to vector<1x1xf32>
    %c1_19 = arith.constant 1 : index
    %c0_20 = arith.constant 0 : index
    %c0_21 = arith.constant 0 : index
    %58 = vector.load %arg1[%c1_19, %c0_20, %c0_21] : memref<2x16x32xf32, #tpu.memory_space<vmem>>, vector<1x16x32xf32>
    %59 = vector.shape_cast %58 : vector<1x16x32xf32> to vector<16x32xf32>
    %cst_22 = arith.constant dense<0.000000e+00> : vector<2x16xf32>
    %60 = tpu.matmul %0, %59, %cst_22 {dimension_numbers = #tpu.dot_dimension_numbers<[0], [1], [1], [0], [0, 1, 1, 0], [], []>} : vector<32x2xf32>, vector<16x32xf32>, vector<2x16xf32> -> vector<2x16xf32>
    %61 = vector.extract_strided_slice %4 {offsets = [8, 0], sizes = [8, 2], strides = [1, 1]} : vector<16x2xf32> to vector<8x2xf32>
    %62 = vector.extract_strided_slice %61 {offsets = [0, 0], sizes = [8, 1], strides = [1, 1]} : vector<8x2xf32> to vector<8x1xf32>
    %63 = vector.extract_strided_slice %60 {offsets = [0, 0], sizes = [1, 16], strides = [1, 1]} : vector<2x16xf32> to vector<1x16xf32>
    %64 = vector.broadcast %62 : vector<8x1xf32> to vector<8x16xf32>
    %65 = vector.broadcast %63 : vector<1x16xf32> to vector<8x16xf32>
    %66 = arith.addf %64, %65 : vector<8x16xf32>
    %67 = vector.extract_strided_slice %61 {offsets = [0, 1], sizes = [8, 1], strides = [1, 1]} : vector<8x2xf32> to vector<8x1xf32>
    %68 = vector.extract_strided_slice %60 {offsets = [1, 0], sizes = [1, 16], strides = [1, 1]} : vector<2x16xf32> to vector<1x16xf32>
    %69 = vector.broadcast %67 : vector<8x1xf32> to vector<8x16xf32>
    %70 = vector.broadcast %68 : vector<1x16xf32> to vector<8x16xf32>
    %71 = arith.addf %69, %70 : vector<8x16xf32>
    %72 = tpu.concatenate %66, %71 in 0 : vector<8x16xf32>, vector<8x16xf32> -> vector<16x16xf32>
    %73 = vector.broadcast %10 : vector<16x1xf32> to vector<16x16xf32>
    %74 = arith.addf %72, %73 : vector<16x16xf32>
    %cst_23 = arith.constant dense<0xFF800000> : vector<16xf32>
    %75 = vector.multi_reduction <maximumf>, %74, %cst_23 [1] : vector<16x16xf32> to vector<16xf32>
    %76 = vector.shape_cast %75 : vector<16xf32> to vector<16x1xf32>
    %77 = vector.broadcast %76 : vector<16x1xf32> to vector<16x16xf32>
    %78 = arith.subf %74, %77 : vector<16x16xf32>
    %79 = math.exp %78 : vector<16x16xf32>
    %cst_24 = arith.constant dense<0.000000e+00> : vector<16xf32>
    %80 = vector.multi_reduction <add>, %79, %cst_24 [1] : vector<16x16xf32> to vector<16xf32>
    %81 = vector.shape_cast %80 : vector<16xf32> to vector<16x1xf32>
    %c1_25 = arith.constant 1 : index
    %c0_26 = arith.constant 0 : index
    %c0_27 = arith.constant 0 : index
    %82 = vector.load %arg5[%c1_25, %c0_26, %c0_27] : memref<2x16x1xi32, #tpu.memory_space<vmem>>, vector<1x16x1xi32>
    %83 = vector.shape_cast %82 : vector<1x16x1xi32> to vector<16x1xi32>
    %84 = vector.broadcast %83 : vector<16x1xi32> to vector<16x16xi32>
    %85 = arith.cmpi eq, %5, %84 : vector<16x16xi32>
    %cst_28 = arith.constant 0.000000e+00 : f32
    %86 = vector.broadcast %cst_28 : f32 to vector<16x16xf32>
    %87 = arith.select %85, %74, %86 : vector<16x16xi1>, vector<16x16xf32>
    %cst_29 = arith.constant dense<0.000000e+00> : vector<16xf32>
    %88 = vector.multi_reduction <add>, %87, %cst_29 [1] : vector<16x16xf32> to vector<16xf32>
    %89 = vector.shape_cast %88 : vector<16xf32> to vector<16x1xf32>
    %90 = arith.subf %89, %76 : vector<16x1xf32>
    %91 = math.log %81 : vector<16x1xf32>
    %92 = arith.subf %90, %91 : vector<16x1xf32>
    %93 = vector.extract_strided_slice %92 {offsets = [0, 0], sizes = [8, 1], strides = [1, 1]} : vector<16x1xf32> to vector<8x1xf32>
    %94 = vector.shape_cast %93 : vector<8x1xf32> to vector<1x8x1xf32>
    %cst_30 = arith.constant dense<0.000000e+00> : vector<1xf32>
    %95 = vector.multi_reduction <add>, %94, %cst_30 [1, 2] : vector<1x8x1xf32> to vector<1xf32>
    %96 = vector.shape_cast %95 : vector<1xf32> to vector<1x1x1xf32>
    %97 = vector.extract %96[0, 0, 0] : f32 from vector<1x1x1xf32>
    %98 = vector.broadcast %97 : f32 to vector<1x1xf32>
    %99 = vector.extract_strided_slice %92 {offsets = [8, 0], sizes = [8, 1], strides = [1, 1]} : vector<16x1xf32> to vector<8x1xf32>
    %100 = vector.shape_cast %99 : vector<8x1xf32> to vector<1x8x1xf32>
    %cst_31 = arith.constant dense<0.000000e+00> : vector<1xf32>
    %101 = vector.multi_reduction <add>, %100, %cst_31 [1, 2] : vector<1x8x1xf32> to vector<1xf32>
    %102 = vector.shape_cast %101 : vector<1xf32> to vector<1x1x1xf32>
    %103 = vector.extract %102[0, 0, 0] : f32 from vector<1x1x1xf32>
    %104 = vector.broadcast %103 : f32 to vector<1x1xf32>
    %105 = tpu.concatenate %51, %98 in 1 : vector<1x1xf32>, vector<1x1xf32> -> vector<1x2xf32>
    %106 = tpu.concatenate %57, %104 in 1 : vector<1x1xf32>, vector<1x1xf32> -> vector<1x2xf32>
    %107 = tpu.concatenate %105, %106 in 0 : vector<1x2xf32>, vector<1x2xf32> -> vector<2x2xf32>
    %c0_32 = arith.constant 0 : index
    %c0_33 = arith.constant 0 : index
    %c0_34 = arith.constant 0 : index
    %108 = vector.load %arg6[%c0_32, %c0_33, %c0_34] : memref<1x2x2xf32, #tpu.memory_space<vmem>>, vector<1x2x2xf32>
    %109 = vector.shape_cast %108 : vector<1x2x2xf32> to vector<2x2xf32>
    %110 = vector.shape_cast %107 : vector<2x2xf32> to vector<1x2x2xf32>
    tpu.vector_store %arg6[%c0_32, %c0_33, %c0_34], %110 {strides = array<i32>} : memref<1x2x2xf32, #tpu.memory_space<vmem>>, vector<1x2x2xf32>,
    return
  }
  func.func @transform_0(%arg0: i32) -> (i32, i32, i32) {
    %c0_i32 = arith.constant 0 : i32
    %c0_i32_0 = arith.constant 0 : i32
    %c0_i32_1 = arith.constant 0 : i32
    return %arg0, %c0_i32, %c0_i32_0 : i32, i32, i32
  }
  func.func @transform_1(%arg0: i32) -> (i32, i32, i32) {
    %c0_i32 = arith.constant 0 : i32
    %c0_i32_0 = arith.constant 0 : i32
    %c0_i32_1 = arith.constant 0 : i32
    return %arg0, %c0_i32, %c0_i32_0 : i32, i32, i32
  }
  func.func @transform_2(%arg0: i32) -> (i32, i32) {
    %c0_i32 = arith.constant 0 : i32
    %c0_i32_0 = arith.constant 0 : i32
    %c0_i32_1 = arith.constant 0 : i32
    return %c0_i32, %c0_i32_0 : i32, i32
  }
  func.func @transform_3(%arg0: i32) -> i32 {
    %c0_i32 = arith.constant 0 : i32
    %c0_i32_0 = arith.constant 0 : i32
    return %c0_i32 : i32
  }
  func.func @transform_4(%arg0: i32) -> (i32, i32, i32) {
    %c0_i32 = arith.constant 0 : i32
    %c0_i32_0 = arith.constant 0 : i32
    %c0_i32_1 = arith.constant 0 : i32
    return %arg0, %c0_i32, %c0_i32_0 : i32, i32, i32
  }
  func.func @transform_5(%arg0: i32) -> (i32, i32, i32) {
    %c0_i32 = arith.constant 0 : i32
    %c0_i32_0 = arith.constant 0 : i32
    %c0_i32_1 = arith.constant 0 : i32
    return %arg0, %c0_i32, %c0_i32_0 : i32, i32, i32
  }
}

</mosaic_0001>

<bundles_post_ra>
// kernel: value_pointer_loss.1
= control target key start
LH: loop header
LB: loop body
LE: loop exit
PB: predicated region body
PF: predicated region fallthrough
CT: control target
= control target key end

     0   :  { %10 = vsyncpa [#allocation3], 0  ;;  %s774_s0 = inlined_call_operand.vmem [shape: f32[2,16,32], index: 0, kind: input, shape index: {}]   ;;  %s775_s1 = inlined_call_operand.vmem [shape: f32[2,8,32], index: 1, kind: input, shape index: {}]   ;;  %s776_s2 = inlined_call_operand.vmem [shape: f32[64,2], index: 2, kind: input, shape index: {}]   ;;  %s777_s3 = inlined_call_operand.vmem [shape: f32[2], index: 3, kind: input, shape index: {}]   ;;  %s778_s4 = inlined_call_operand.vmem [shape: s32[2,16,1], index: 4, kind: input, shape index: {}]   ;;  %s779_s5 = inlined_call_operand.vmem [shape: f32[1,2,2], index: 5, kind: output, shape index: {}]  }
   0x1   :  { %s23_s20 = sshll.u32 %s777_s3, 4  ;;  %s24_s20 = int_to_ptr.vmem [resolvable:$true] %s23_s20 }
   0x2   :  { %s626_s21 = scalar_lea.vmem %s24_s20, 16  ;;  %p631_p1 = scmp.lt.s32.totalorder %s24_s20, %s24_s20 }
   0x3   :  { %p627_p0 = scmp.ne.s32.totalorder %s24_s20, %s626_s21  ;;  %p632_p2 = scmp.lt.s32.totalorder %s626_s21, %s626_s21 }
   0x5   :  { %p633_p3 = por %p632_p2, %p631_p1 }
   0x7   :  { %p634_p4 = pnand %p633_p3, %p627_p0 }
   0x9   :  { %637 = shalt.err (!%p634_p4)
}
   0xa   :  { %s640_s22 = smov [#allocation2]  }
   0xb   :  { %26 = dma.vmem_to_smem %s24_s20, 16, %s640_s22, [#allocation3]  }
   0xc   :  { %638 = dma.done.wait [#allocation3], 16  }
   0xd   :  { %639 = vsyncadd [#allocation3], 4294967280 }
   0xe   :  { %32 = sfence }
   0xf   :  { %v37_v0 = vld [vmem:[%s776_s2 + $0x20] sm:$0xff]  ;;  %v38_v1 = vld [vmem:[%s776_s2 + $0x28] sm:$0xff]  ;;  %v39_v2 = vld [vmem:[%s776_s2 + $0x30] sm:$0xff]  ;;  %vm43_vm0 = vcmask 261120   ;;  %v641_v7 = vmov 0.0|0.0   ;;  %vm642_vm1 = vmmov 0   ;;  %v125_v29 = vlaneseq }
  0x10   :  { %v574_v3 = vpack.c.bf16 %v38_v1, %v37_v0  ;;  %v40_v4 = vld [vmem:[%s776_s2 + $0x38] sm:$0xff]  ;;  %v33_v5 = vld [vmem:[%s776_s2] sm:$0xff]  ;;  %582 = vmatprep.subr.bf16.mxu1 %v641_v7  ;;  %v34_v9 = vld [vmem:[%s776_s2 + $0x8] sm:$0xff]  ;;  %v643_v10 = vmov 0.0   ;;  %v644_v13 = vmov 0   ;;  %v645_v25 = vmov 1  }
  0x11   :  { %v41_v6 = vld [vmem:[%s775_s1] sm:$0xff]  ;;  %v578_v8 = vpack.c.bf16 %v40_v4, %v39_v2  ;;  %133 = vxpose.xlu0.b32.start [1/4] (short) (narrow) %v33_v5, 8  ;;  %564 = vmatprep.mubr.msk.f32.mxu1 %vm642_vm1, %v643_v10  ;;  %v132_v12 = vld [vmem:[%s774_s0 + $0x8] sm:$0xff]  ;;  %vm584_vm2 = vmpackc.low %vm43_vm0, %vm43_vm0  ;;  %v250_v30 = vshrl.u32 %v125_v29, 7  ;;  %vm275_vm3 = vcmask 130048   ;;  %vm320_vm8 = vcmask 7168  }
  0x12   :  { %557 = vmatprep.mubr.msk.f32.mxu0 %vm43_vm0, %v41_v6  ;;  %575 = vmatprep.subr.bf16.mxu0 %v574_v3  ;;  %v131_v11 = vld [vmem:[%s774_s0] sm:$0xff]  ;;  %v35_v15 = vld [vmem:[%s776_s2 + $0x10] sm:$0xff]  ;;  %v42_v16 = vld [vmem:[%s775_s1 + $0x8] sm:$0xff]  ;;  %s127_s1 = sld [smem:[#allocation2]]  ;;  %vm515_vm9 = vcmask 1040384   ;;  %vm517_vm10 = vcmask 9216  }
  0x13   :  { %577 = vmatpush3.bf16.msra.mxu0 %v574_v3  ;;  %605 = vset.pattern.permute.xlu1 %v644_v13  ;;  %v583_v14 = vpack.c.bf16 %v132_v12, %v131_v11  ;;  %v530_v17 = vld [vmem:[%s774_s0 + $0x10] sm:$0xff]  ;;  %v531_v18 = vld [vmem:[%s774_s0 + $0x18] sm:$0xff]  ;;  %s526_s0 = sld [smem:[#allocation2 + $0x1]]  ;;  %v294_v27 = vld [vmem:[%s778_s4] sm:$0xff]  ;;  %v251_v33 = vsub.s32 0, %v250_v30  ;;  %v260_v44 = vsub.s32 1, %v250_v30 }
  0x14   :  { %579 = vmatprep.subr.bf16.mxu0 %v578_v8  ;;  %v36_v19 = vld [vmem:[%s776_s2 + $0x18] sm:$0xff]  ;;  %v587_v20 = vpack.c.bf16 %v531_v18, %v530_v17  ;;  %v295_v28 = vld [vmem:[%s778_s4 + $0x8] sm:$0xff]  ;;  %v535_v60 = vld [vmem:[%s778_s4 + $0x10] sm:$0xff] }
  0x15   :  { %134 = vxpose.xlu0.b32.cont [2/4] (short) (narrow) %v34_v9, 8  ;;  %585 = vmatpush3.bf16.xpose.msk.msra.mxu1 %vm584_vm2, %v583_v14  ;;  %v536_v56 = vld [vmem:[%s778_s4 + $0x18] sm:$0xff] }
  0x17   :  { %581 = vmatpush3.bf16.msra.mxu0 %v578_v8 }
  0x18   :  { %586 = vmatprep.subr.bf16.mxu0 %v641_v7  ;;  %v128_v21 = vstv %s127_s1 }
  0x19   :  { %135 = vxpose.xlu0.b32.cont [3/4] (short) (narrow) %v35_v15, 8  ;;  %v130_v26 = vstv %s526_s0 }
  0x1a   :  { %558 = vmatmul.mubr.msk.f32.vlgmr.msra.gmra.mrb[0].mxu0 %vm43_vm0, %v42_v16 }
  0x1b   :  { %571 = vmatprep.mubr.msk.f32.mxu0 %vm642_vm1, %v643_v10 }
  0x1d   :  { %136 = vxpose.xlu0.b32.end [4/4] (short) (narrow) %v36_v19, 8 }
  0x20   :  { %589 = vmatpush3.bf16.xpose.msk.msra.mxu0 %vm584_vm2, %v587_v20 }
  0x46   :  { %604 = vset.pattern.permute.xlu0 %v644_v13 }
  0x47   :  { %265 = vperm.xlu0 %604, %v128_v21  }
  0x91   :  { %v149_v22 = vpop.trf.xlu0 }
  0x92   :  { %572 = vmatmul.mubr.msk.f32.vlgmr.msra.gmra.mrb[2].mxu0 %vm43_vm0, %v149_v22  ;;  %565 = vmatmul.mubr.msk.f32.vlgmr.msra.gmra.mrb[0].mxu1 %vm43_vm0, %v149_v22 }
  0xc6   :  { %v266_v38 = vpop.permute.xlu0 %265 }
  0xed   :  { %v559_v23 = vpop.f32.mrb[0].mxu0 }
  0xee   :  { %424 = vperm.xlu1 %605, %v559_v23   ;;  %v116_v24 = vpop.f32.mrb[1].mxu0 }
  0xf2   :  { %606 = vset.pattern.permute.xlu1 %v645_v25 }
  0xf3   :  { %433 = vperm.xlu1 %606, %v559_v23  }
  0xf7   :  { %607 = vset.pattern.permute.xlu1 %v644_v13 }
  0xf8   :  { %246 = vperm.xlu1 %607, %v116_v24  }
  0xfc   :  { %608 = vset.pattern.permute.xlu1 %v645_v25 }
  0xfd   :  { %255 = vperm.xlu1 %608, %v116_v24  }
 0x101   :  { %609 = vset.pattern.permute.xlu1 %v644_v13  ;;  %v126_v13 = vand.u32 127, %v125_v29 }
 0x102   :  { %270 = vperm.xlu1 %609, %v130_v26  }
 0x106   :  { %297 = vperm.xlu1 %609, %v294_v27  }
 0x10a   :  { %300 = vperm.xlu1 %609, %v295_v28  }
 0x165   :  { %v418_v31 = vpop.f32.mrb[2].mxu0  ;;  %v240_v32 = vpop.f32.mrb[0].mxu1 }
 0x166   :  { %v566_v34 = vpop.f32.mrb[1].mxu1  ;;  %v573_v35 = vpop.f32.mrb[3].mxu0  ;;  %v430_v36 = vrot.slane %v418_v31, %v251_v33  ;;  %v439_v45 = vrot.slane %v418_v31, %v260_v44  ;;  %v252_v46 = vrot.slane %v240_v32, %v251_v33  ;;  %v261_v51 = vrot.slane %v240_v32, %v260_v44 }
 0x16d   :  { %v425_v37 = vpop.permute.xlu1 %424 }
 0x16e   :  { %v431_v39 = vadd.f32 %v430_v36, %v425_v37 }
 0x170   :  { %v441_v40 = vadd.f32 %v431_v39, %v266_v38 }
 0x172   :  { %v434_v41 = vpop.permute.xlu1 %433  ;;  %v443_v42 = vsel %vm275_vm3, %v441_v40, -inf }
 0x173   :  { %444 = vmax.xlane.f32.xlu0 %v443_v42  ;;  %v440_v48 = vadd.f32 %v439_v45, %v434_v41 }
 0x177   :  { %v247_v43 = vpop.permute.xlu1 %246 }
 0x178   :  { %v253_v49 = vadd.f32 %v252_v46, %v247_v43 }
 0x17a   :  { %v273_v53 = vadd.f32 %v266_v38, %v253_v49 }
 0x17c   :  { %v256_v47 = vpop.permute.xlu1 %255  ;;  %v276_v58 = vsel %vm275_vm3, %v273_v53, -inf }
 0x17d   :  { %v262_v55 = vadd.f32 %v261_v51, %v256_v47 }
 0x181   :  { %v271_v50 = vpop.permute.xlu1 %270 }
 0x182   :  { %v442_v52 = vadd.f32 %v440_v48, %v271_v50  ;;  %v274_v57 = vadd.f32 %v271_v50, %v262_v55 }
 0x184   :  { %v446_v54 = vsel %vm275_vm3, %v442_v52, -inf  ;;  %v279_v59 = vsel %vm275_vm3, %v274_v57, -inf }
 0x185   :  { %447 = vmax.xlane.f32.xlu1 %v446_v54  ;;  %v298_v61 = vpop.permute.xlu1 %297 }
 0x186   :  { %vm302_vm5 = vcmp.eq.s32.totalorder %v126_v13, %v298_v61 }
 0x187   :  { %v304_v23 = vsel %vm302_vm5, %v273_v53, 0.0 }
 0x188   :  { %v306_v25 = vsel %vm275_vm3, %v304_v23, 0.0 }
 0x189   :  { %277 = vmax.xlane.f32.xlu1 %v276_v58  ;;  %468 = vperm.xlu0 %604, %v536_v56   ;;  %v301_v62 = vpop.permute.xlu1 %300 }
 0x18a   :  { %vm303_vm6 = vcmp.eq.s32.totalorder %v126_v13, %v301_v62 }
 0x18b   :  { %v305_v26 = vsel %vm303_vm6, %v274_v57, 0.0 }
 0x18c   :  { %v309_v27 = vsel %vm275_vm3, %v305_v26, 0.0 }
 0x18d   :  { %280 = vmax.xlane.f32.xlu1 %v279_v59 }
 0x19e   :  { %465 = vperm.xlu1 %609, %v535_v60  }
 0x200   :  { %v745_v63 = vpop.xlane.xlu0 %444 }
 0x201   :  { %v449_v1 = vsub.f32 %v441_v40, %v745_v63 }
 0x203   :  { %v451_v4 = vmul.f32 1.442695, %v449_v1 }
 0x208   :  { %v469_v24 = vpop.permute.xlu0 %468 }
 0x209   :  { %vm471_vm7 = vcmp.eq.s32.totalorder %v126_v13, %v469_v24 }
 0x20a   :  { %v473_v28 = vsel %vm471_vm7, %v442_v52, 0.0 }
 0x20b   :  { %v477_v29 = vsel %vm275_vm3, %v473_v28, 0.0 }
 0x212   :  { %v747_v0 = vpop.xlane.xlu1 %447 }
 0x213   :  { %v450_v5 = vsub.f32 %v442_v52, %v747_v0 }
 0x215   :  { %v453_v9 = vmul.f32 1.442695, %v450_v5 }
 0x216   :  { %v278_v2 = vpop.xlane.xlu1 %277 }
 0x217   :  { %v282_v3 = vsub.f32 %v273_v53, %v278_v2 }
 0x219   :  { %v284_v6 = vmul.f32 1.442695, %v282_v3 }
 0x21a   :  { %v751_v7 = vpop.xlane.xlu1 %280 }
 0x21b   :  { %610 = vpow2.f32 %v284_v6  ;;  %v283_v8 = vsub.f32 %v274_v57, %v751_v7 }
 0x21c   :  { %612 = vpow2.f32 %v451_v4 }
 0x21d   :  { %v286_v10 = vmul.f32 1.442695, %v283_v8 }
 0x21e   :  { %v466_v12 = vpop.permute.xlu1 %465 }
 0x21f   :  { %614 = vpow2.f32 %v286_v10  ;;  %vm470_vm4 = vcmp.eq.s32.totalorder %v126_v13, %v466_v12 }
 0x220   :  { %616 = vpow2.f32 %v453_v9  ;;  %v472_v20 = vsel %vm470_vm4, %v441_v40, 0.0 }
 0x221   :  { %v474_v21 = vsel %vm275_vm3, %v472_v20, 0.0 }
 0x225   :  { %v611_v11 = vpop.eup %610 }
 0x226   :  { %v288_v14 = vsel %vm275_vm3, %v611_v11, 0.0  ;;  %v613_v15 = vpop.eup %612 }
 0x227   :  { %289 = vadd.xlane.f32.xlu1 %v288_v14  ;;  %v455_v18 = vsel %vm275_vm3, %v613_v15, 0.0 }
 0x229   :  { %v615_v16 = vpop.eup %614 }
 0x22a   :  { %v291_v17 = vsel %vm275_vm3, %v615_v16, 0.0  ;;  %v617_v19 = vpop.eup %616 }
 0x22b   :  { %292 = vadd.xlane.f32.xlu0 %v291_v17  ;;  %456 = vadd.xlane.f32.xlu1 %v455_v18  ;;  %v458_v22 = vsel %vm275_vm3, %v617_v19, 0.0 }
 0x22f   :  { %475 = vadd.xlane.f32.xlu0 %v474_v21  ;;  %459 = vadd.xlane.f32.xlu1 %v458_v22 }
 0x233   :  { %307 = vadd.xlane.f32.xlu1 %v306_v25 }
 0x237   :  { %310 = vadd.xlane.f32.xlu1 %v309_v27 }
 0x23b   :  { %478 = vadd.xlane.f32.xlu1 %v477_v29 }
 0x2b4   :  { %v290_v30 = vpop.xlane.xlu1 %289 }
 0x2b5   :  { %618 = vlog2.f32 %v290_v30 }
 0x2b8   :  { %v457_v31 = vpop.xlane.xlu1 %456  ;;  %v293_v32 = vpop.xlane.xlu0 %292 }
 0x2b9   :  { %620 = vlog2.f32 %v457_v31 }
 0x2ba   :  { %622 = vlog2.f32 %v293_v32 }
 0x2bc   :  { %v460_v33 = vpop.xlane.xlu1 %459  ;;  %v476_v37 = vpop.xlane.xlu0 %475 }
 0x2bd   :  { %624 = vlog2.f32 %v460_v33  ;;  %v480_v43 = vsub.f32 %v476_v37, %v745_v63 }
 0x2bf   :  { %v619_v34 = vpop.eup %618 }
 0x2c0   :  { %v315_v35 = vmul.f32 0.6931472, %v619_v34  ;;  %v308_v36 = vpop.xlane.xlu1 %307 }
 0x2c1   :  { %v312_v38 = vsub.f32 %v308_v36, %v278_v2 }
 0x2c3   :  { %v621_v39 = vpop.eup %620  ;;  %v318_v40 = vsub.f32 %v312_v38, %v315_v35 }
 0x2c4   :  { %v623_v41 = vpop.eup %622  ;;  %v483_v42 = vmul.f32 0.6931472, %v621_v39  ;;  %v311_v44 = vpop.xlane.xlu1 %310 }
 0x2c5   :  { %v317_v45 = vmul.f32 0.6931472, %v623_v41  ;;  %v313_v46 = vsub.f32 %v311_v44, %v751_v7  ;;  %v321_v47 = vsel %vm320_vm8, %v318_v40, 0.0 }
 0x2c6   :  { %322 = vadd.xlane.f32.xlu0 %v321_v47  ;;  %v486_v48 = vsub.f32 %v480_v43, %v483_v42 }
 0x2c7   :  { %v625_v49 = vpop.eup %624  ;;  %v319_v50 = vsub.f32 %v313_v46, %v317_v45 }
 0x2c8   :  { %v485_v51 = vmul.f32 0.6931472, %v625_v49  ;;  %v479_v52 = vpop.xlane.xlu1 %478  ;;  %v488_v53 = vsel %vm320_vm8, %v486_v48, 0.0 }
 0x2c9   :  { %v481_v54 = vsub.f32 %v479_v52, %v747_v0  ;;  %v332_v55 = vsel %vm320_vm8, %v319_v50, 0.0 }
 0x2ca   :  { %333 = vadd.xlane.f32.xlu1 %v332_v55  ;;  %489 = vadd.xlane.f32.xlu0 %v488_v53 }
 0x2cb   :  { %v487_v56 = vsub.f32 %v481_v54, %v485_v51 }
 0x2cd   :  { %v499_v57 = vsel %vm320_vm8, %v487_v56, 0.0 }
 0x2ce   :  { %500 = vadd.xlane.f32.xlu1 %v499_v57 }
 0x353   :  { %v323_v58 = vpop.xlane.xlu0 %322 }
 0x354   :  { %v324_v59 = vrot.slane %v323_v58, 4 }
 0x356   :  { %v325_v60 = vadd.f32 %v324_v59, %v323_v58 }
 0x357   :  { %v334_v61 = vpop.xlane.xlu1 %333  ;;  %v490_v62 = vpop.xlane.xlu0 %489 }
 0x358   :  { %v326_v63 = vrot.slane %v325_v60, 2  ;;  %v335_v1 = vrot.slane %v334_v61, 4  ;;  %v491_v2 = vrot.slane %v490_v62, 4 }
 0x35a   :  { %v336_v3 = vadd.f32 %v335_v1, %v334_v61  ;;  %v492_v4 = vadd.f32 %v491_v2, %v490_v62  ;;  %v327_v5 = vadd.f32 %v326_v63, %v325_v60 }
 0x35b   :  { %v501_v0 = vpop.xlane.xlu1 %500 }
 0x35c   :  { %v337_v6 = vrot.slane %v336_v3, 2  ;;  %v493_v7 = vrot.slane %v492_v4, 2  ;;  %v502_v8 = vrot.slane %v501_v0, 4  ;;  %v328_v9 = vrot.slane %v327_v5, 1 }
 0x35e   :  { %v494_v10 = vadd.f32 %v493_v7, %v492_v4  ;;  %v503_v11 = vadd.f32 %v502_v8, %v501_v0  ;;  %v329_v12 = vadd.f32 %v328_v9, %v327_v5  ;;  %v338_v13 = vadd.f32 %v337_v6, %v336_v3 }
 0x360   :  { %v504_v14 = vrot.slane %v503_v11, 2  ;;  %590 = vpush %v329_v12  ;;  %v339_v15 = vrot.slane %v338_v13, 1  ;;  %v495_v16 = vrot.slane %v494_v10, 1 }
 0x362   :  { %v505_v17 = vadd.f32 %v504_v14, %v503_v11  ;;  %v340_v18 = vadd.f32 %v339_v15, %v338_v13  ;;  %v496_v19 = vadd.f32 %v495_v16, %v494_v10 }
 0x364   :  { %592 = vpush %v340_v18  ;;  %v506_v20 = vrot.slane %v505_v17, 1 }
 0x365   :  { %594 = vpush %v496_v19 }
 0x366   :  { %v507_v21 = vadd.f32 %v506_v20, %v505_v17 }
 0x368   :  { %596 = vpush %v507_v21 }
 0x391   :  { %s591_s4 = spop %590 }
 0x392   :  { %v331_v26 = vstv %s591_s4 }
 0x395   :  { %s593_s6 = spop %592 }
 0x396   :  { %s595_s7 = spop %594  ;;  %v342_v22 = vstv %s593_s6 }
 0x397   :  { %v498_v23 = vstv %s595_s7 }
 0x398   :  { %v510_v28 = vsel %vm320_vm8, %v331_v26, %v498_v23 }
 0x399   :  { %s597_s8 = spop %596 }
 0x39a   :  { %v509_v24 = vstv %s597_s8 }
 0x39b   :  { %v511_v25 = vsel %vm320_vm8, %v342_v22, %v509_v24 }
 0x39c   :  { %v513_v27 = vrot.slane %v511_v25, 7 }
 0x39e   :  { %v516_v29 = vsel %vm515_vm9, %v510_v28, %v513_v27 }
 0x39f   :  { %518 = vst.msk [vmem:[%s779_s5] sm:$0x3] %vm517_vm10, %v516_v29 }
 0x3a0   :  { %523 = vsyncpa [#allocation3], 1 }

</bundles_post_ra>
